<compile_context>
chip_gen: v5e
topology: v5e:2x2
jax: 0.10.0
libtpu: 0.0.40
codegen_flags: <defaults>
</compile_context>

<pallas_src>
import functools

import jax
import jax.numpy as jnp
from jax.experimental import pallas as pl
from jax.experimental.pallas import tpu as pltpu

_HIGHEST = jax.lax.Precision.HIGHEST


# ----------------------------------------------------------------------------
# Kernel 1: fused projection  [g_r | g_l] = h @ [W_r^T | W_l^T], head-major out
# ----------------------------------------------------------------------------
def _proj_kernel(h_ref, w_ref, gr_ref, glt_ref, *, n_heads, n_hidden):
    x = h_ref[0]                                                    # (TN, in_feat)
    y = jnp.dot(x, w_ref[...], preferred_element_type=jnp.float32,
                precision=_HIGHEST)                                 # (TN, 2*H*F)
    hf = n_heads * n_hidden
    for h in range(n_heads):                                        # small static loop
        q = y[:, h * n_hidden:(h + 1) * n_hidden]                   # (TN, F)  g_r
        k = y[:, hf + h * n_hidden:hf + (h + 1) * n_hidden]         # (TN, F)  g_l
        gr_ref[0, h] = q.astype(gr_ref.dtype)                       # (TN, F)
        glt_ref[0, h] = k.T.astype(glt_ref.dtype)                   # (F, TN) keys on lanes


# ----------------------------------------------------------------------------
# Kernel 2: GATv2 attention for one (batch, q-tile, head) grid point
# ----------------------------------------------------------------------------
def _attn_kernel(grq_ref, glt_ref, grv_ref, mask_ref, aw_ref, out_ref, *,
                 negative_slope, mask_value, kv_chunk):
    grq = grq_ref[0, 0].astype(jnp.float32)                         # (TQ, F)  queries (g_r)
    glt = glt_ref[0, 0].astype(jnp.float32)                         # (F, N)   keys (g_l^T)
    aw = aw_ref[...].astype(jnp.float32)                            # (F, 1)
    aw_b = aw[None, :, :]                                           # (1, F, 1)

    n_kv = glt.shape[-1]
    e_parts = []
    for c0 in range(0, n_kv, kv_chunk):                             # bounded (TQ,F,TK) chunk
        glt_c = glt[:, c0:c0 + kv_chunk]                            # (F, TK)
        s = grq[:, :, None] + glt_c[None, :, :]                     # (TQ, F, TK)
        if 0.0 <= negative_slope <= 1.0:
            s = jnp.maximum(s, negative_slope * s)                  # LeakyReLU (2 ops/elem)
        else:
            s = jnp.where(s >= 0, s, negative_slope * s)
        e_parts.append(jnp.sum(s * aw_b, axis=1))                   # (TQ, TK) logits
    e = e_parts[0] if len(e_parts) == 1 else jnp.concatenate(e_parts, axis=-1)

    msk = mask_ref[0, 0]                                            # (TQ, N) int8
    e = jnp.where(msk == 0, mask_value, e)

    # Exact softmax over the kv axis (full row is resident).
    m = jnp.max(e, axis=-1, keepdims=True)                          # (TQ, 1)
    p = jnp.exp(e - m)                                              # (TQ, N)
    denom = jnp.sum(p, axis=-1, keepdims=True)                      # (TQ, 1)

    v = grv_ref[0, 0]                                               # (N, F) values (g_r)
    o = jnp.dot(p.astype(v.dtype), v, preferred_element_type=jnp.float32,
                precision=_HIGHEST)                                 # (TQ, F)
    out_ref[0, 0] = (o / denom).astype(out_ref.dtype)


# ----------------------------------------------------------------------------
# Wrapper
# ----------------------------------------------------------------------------
def gatv2_forward(h, adj_mat, W_l, W_r, attn_w, *, n_heads, n_hidden,
                  is_concat=True, negative_slope=0.21, mask_value=-60000.0,
                  q_block=128, kv_block=512, proj_block=256,
                  compute_dtype=jnp.bfloat16):
    b, n, in_feat = h.shape
    H, F = n_heads, n_hidden
    HF = H * F

    # Tile choices: fall back to the full extent when the block does not divide n
    # (a full-extent dim always satisfies the (8, 128) block constraint).
    TQ = q_block if (q_block <= n and n % q_block == 0) else n
    TK = kv_block if (kv_block <= n and n % kv_block == 0) else n
    TN = proj_block if (proj_block <= n and n % proj_block == 0
                        and proj_block % 128 == 0) else n

    h_c = h.astype(compute_dtype)
    # Fused projection weight: cols [0, HF) -> W_r (query/value), [HF, 2HF) -> W_l (key).
    w_fused = jnp.concatenate(
        [jnp.asarray(W_r).T, jnp.asarray(W_l).T], axis=1).astype(compute_dtype)

    proj = functools.partial(_proj_kernel, n_heads=H, n_hidden=F)
    g_r, g_l_t = pl.pallas_call(
        proj,
        out_shape=(jax.ShapeDtypeStruct((b, H, n, F), compute_dtype),    # queries/values
                   jax.ShapeDtypeStruct((b, H, F, n), compute_dtype)),   # keys (transposed)
        grid_spec=pltpu.PrefetchScalarGridSpec(
            num_scalar_prefetch=0,
            grid=(b, n // TN),
            in_specs=[
                pl.BlockSpec((1, TN, in_feat), lambda bi, ni: (bi, ni, 0)),
                pl.BlockSpec((in_feat, 2 * HF), lambda bi, ni: (0, 0)),
            ],
            out_specs=[
                pl.BlockSpec((1, H, TN, F), lambda bi, ni: (bi, 0, ni, 0)),
                pl.BlockSpec((1, H, F, TN), lambda bi, ni: (bi, 0, 0, ni)),
            ]),
        compiler_params=pltpu.CompilerParams(
            dimension_semantics=("parallel", "parallel"),
            vmem_limit_bytes=32 * 1024 * 1024),
    )(h_c, w_fused)

    # Adjacency -> int8 mask (b, H_adj, n, n); no head broadcast in HBM.
    adj = jnp.asarray(adj_mat)
    H_adj = adj.shape[3]                                  # 1 or n_heads
    adj_b = jnp.broadcast_to(adj != 0, (b, n, n, H_adj))
    if H_adj == 1:
        mask = adj_b.reshape(b, 1, n, n).astype(jnp.int8)         # pure reshape, no transpose
    else:
        mask = jnp.transpose(adj_b, (0, 3, 1, 2)).astype(jnp.int8)

    aw = jnp.asarray(attn_w).reshape(F, 1).astype(jnp.float32)

    kern = functools.partial(_attn_kernel, negative_slope=negative_slope,
                             mask_value=mask_value, kv_chunk=TK)

    if H_adj > 1:
        mask_map = lambda bi, qi, hi: (bi, hi, qi, 0)
    else:
        mask_map = lambda bi, qi, hi: (bi, 0, qi, 0)      # reused across inner head axis

    out_hm = pl.pallas_call(
        kern,
        out_shape=jax.ShapeDtypeStruct((b, H, n, F), jnp.float32),
        grid_spec=pltpu.PrefetchScalarGridSpec(
            num_scalar_prefetch=0,
            grid=(b, n // TQ, H),                          # head axis innermost
            in_specs=[
                pl.BlockSpec((1, 1, TQ, F), lambda bi, qi, hi: (bi, hi, qi, 0)),  # g_r (query)
                pl.BlockSpec((1, 1, F, n), lambda bi, qi, hi: (bi, hi, 0, 0)),    # g_l^T (keys)
                pl.BlockSpec((1, 1, n, F), lambda bi, qi, hi: (bi, hi, 0, 0)),    # g_r (values)
                pl.BlockSpec((1, 1, TQ, n), mask_map),                            # int8 mask
                pl.BlockSpec((F, 1), lambda bi, qi, hi: (0, 0)),                  # attn weight
            ],
            out_specs=pl.BlockSpec((1, 1, TQ, F),
                                   lambda bi, qi, hi: (bi, hi, qi, 0))),
        compiler_params=pltpu.CompilerParams(
            dimension_semantics=("parallel", "parallel", "arbitrary"),
            vmem_limit_bytes=32 * 1024 * 1024),
    )(g_r, g_l_t, g_r, mask, aw)

    if is_concat:
        return jnp.transpose(out_hm, (0, 2, 1, 3)).reshape(b, n, HF)   # (b, n, H*F)
    return out_hm.mean(axis=1)                                          # (b, n, F)


# ----------------------------------------------------------------------------
# Pure-JAX reference mirroring the PyTorch forward (dropout = identity)
# ----------------------------------------------------------------------------
def gatv2_reference(h, adj_mat, W_l, W_r, attn_w, *, n_heads, n_hidden,
                    is_concat=True, negative_slope=0.21, mask_value=-60000.0):
    b, n, _ = h.shape
    g_l = jnp.matmul(h, W_l.T, precision=_HIGHEST).reshape(b, n, n_heads, n_hidden)
    g_r = jnp.matmul(h, W_r.T, precision=_HIGHEST).reshape(b, n, n_heads, n_hidden)
    g_sum = g_r[:, :, None, :, :] + g_l[:, None, :, :, :]
    act = jnp.where(g_sum >= 0, g_sum, negative_slope * g_sum)
    e = jnp.einsum('bijhf,f->bijh', act, attn_w.reshape(-1), precision=_HIGHEST)
    adj = jnp.broadcast_to(adj_mat != 0, (b, n, n, n_heads))
    e = jnp.where(adj, e, mask_value)
    a = jax.nn.softmax(e, axis=2)
    attn_res = jnp.einsum('bijh,bjhf->bihf', a, g_r, precision=_HIGHEST)
    if is_concat:
        return attn_res.reshape(b, n, n_heads * n_hidden)
    return attn_res.mean(axis=2)


if __name__ == "__main__":
    key = jax.random.PRNGKey(0)

    def make_inputs(k, batch, n_nodes, in_features, n_heads, n_hidden):
        k_h, k_adj, k_wl, k_wr, k_aw = jax.random.split(k, 5)
        hh = jax.random.normal(k_h, (batch, n_nodes, in_features), jnp.float32)
        adj = (jax.random.uniform(k_adj, (batch, n_nodes, n_nodes, 1)) > 0.4
               ).astype(jnp.float32)
        W_l = 0.1 * jax.random.normal(k_wl, (n_heads * n_hidden, in_features), jnp.float32)
        W_r = 0.1 * jax.random.normal(k_wr, (n_heads * n_hidden, in_features), jnp.float32)
        aw = 0.1 * jax.random.normal(k_aw, (1, n_hidden), jnp.float32)
        return hh, adj, W_l, W_r, aw

    # ---- case 1: small shapes consistent with the module (single q/kv tile) ----
    batch, n_nodes, in_features, out_features, n_heads = 2, 8, 32, 32, 4
    n_hidden = out_features // n_heads  # 8
    k1, k2 = jax.random.split(key)
    h, adj, W_l, W_r, aw = make_inputs(k1, batch, n_nodes, in_features,
                                       n_heads, n_hidden)

    ref = gatv2_reference(h, adj, W_l, W_r, aw,
                          n_heads=n_heads, n_hidden=n_hidden)

    out_f32 = gatv2_forward(h, adj, W_l, W_r, aw,
                            n_heads=n_heads, n_hidden=n_hidden,
                            compute_dtype=jnp.float32)
    out_f32 = jax.block_until_ready(out_f32)
    assert out_f32.shape == (batch, n_nodes, n_heads * n_hidden)
    assert jnp.allclose(out_f32, ref, rtol=2e-3, atol=2e-3), (
        "f32 kernel mismatch: max abs err = %e"
        % float(jnp.max(jnp.abs(out_f32 - ref))))

    out_bf16 = gatv2_forward(h, adj, W_l, W_r, aw,
                             n_heads=n_heads, n_hidden=n_hidden,
                             compute_dtype=jnp.bfloat16)
    out_bf16 = jax.block_until_ready(out_bf16)
    assert jnp.allclose(out_bf16, ref, rtol=3e-2, atol=3e-2), "bf16 kernel mismatch"

    # ---- case 2: multi q-tile + multi kv-chunk grid ----
    batch2, n_nodes2 = 1, 256
    h2, adj2, W_l2, W_r2, aw2 = make_inputs(k2, batch2, n_nodes2, in_features,
                                            n_heads, n_hidden)
    ref2 = gatv2_reference(h2, adj2, W_l2, W_r2, aw2,
                           n_heads=n_heads, n_hidden=n_hidden)
    out2 = gatv2_forward(h2, adj2, W_l2, W_r2, aw2,
                         n_heads=n_heads, n_hidden=n_hidden,
                         q_block=128, kv_block=128, proj_block=128,
                         compute_dtype=jnp.float32)
    out2 = jax.block_until_ready(out2)
    assert jnp.allclose(out2, ref2, rtol=2e-3, atol=2e-3), (
        "multi-tile mismatch: max abs err = %e"
        % float(jnp.max(jnp.abs(out2 - ref2))))

    # ---- case 3: non-concat (mean over heads) path ----
    ref_m = gatv2_reference(h, adj, W_l, W_r, aw, n_heads=n_heads,
                            n_hidden=n_hidden, is_concat=False)
    out_m = gatv2_forward(h, adj, W_l, W_r, aw, n_heads=n_heads,
                          n_hidden=n_hidden, is_concat=False,
                          compute_dtype=jnp.float32)
    out_m = jax.block_until_ready(out_m)
    assert jnp.allclose(out_m, ref_m, rtol=2e-3, atol=2e-3), "mean-head mismatch"

    print("KERNEL_OK")
</pallas_src>

<mosaic_0001>
module attributes {stable_mosaic.version = 11 : i64} {
  func.func @_proj_kernel(%arg0: i32, %arg1: i32, %arg2: memref<1x8x32xf32, #tpu.memory_space<vmem>>, %arg3: memref<32x64xf32, #tpu.memory_space<vmem>>, %arg4: memref<1x4x8x8xf32, #tpu.memory_space<vmem>>, %arg5: memref<1x4x8x8xf32, #tpu.memory_space<vmem>>) attributes {dimension_semantics = [#tpu.dimension_semantics<parallel>, #tpu.dimension_semantics<parallel>], iteration_bounds = array<i64: 2, 1>, scalar_prefetch = 0 : i64, scratch_operands = 0 : i64, tpu.core_type = #tpu.core_type<tc>, window_params = [{transform_indices = @transform_0, window_bounds = array<i64: 1, 8, 32>}, {pipeline_mode = #tpu.pipeline_mode<synchronous>, transform_indices = @transform_1, window_bounds = array<i64: 32, 64>}, {transform_indices = @transform_2, window_bounds = array<i64: 1, 4, 8, 8>}, {transform_indices = @transform_3, window_bounds = array<i64: 1, 4, 8, 8>}]} {
    %c0 = arith.constant 0 : index
    %c0_0 = arith.constant 0 : index
    %c0_1 = arith.constant 0 : index
    %0 = vector.load %arg2[%c0, %c0_0, %c0_1] : memref<1x8x32xf32, #tpu.memory_space<vmem>>, vector<1x8x32xf32>
    %1 = vector.shape_cast %0 : vector<1x8x32xf32> to vector<8x32xf32>
    %c0_2 = arith.constant 0 : index
    %c0_3 = arith.constant 0 : index
    %2 = vector.load %arg3[%c0_2, %c0_3] : memref<32x64xf32, #tpu.memory_space<vmem>>, vector<32x64xf32>
    %cst = arith.constant dense<0.000000e+00> : vector<8x64xf32>
    %3 = tpu.matmul %1, %2, %cst {dimension_numbers = #tpu.dot_dimension_numbers<[1], [0], [0], [1], [0, 0, 1, 1], [], []>, precision = #tpu.contract_precision<fp32>} : vector<8x32xf32>, vector<32x64xf32>, vector<8x64xf32> -> vector<8x64xf32>
    %4 = vector.extract_strided_slice %3 {offsets = [0, 0], sizes = [8, 8], strides = [1, 1]} : vector<8x64xf32> to vector<8x8xf32>
    %5 = vector.extract_strided_slice %3 {offsets = [0, 32], sizes = [8, 8], strides = [1, 1]} : vector<8x64xf32> to vector<8x8xf32>
    %c0_4 = arith.constant 0 : index
    %c0_5 = arith.constant 0 : index
    %c0_6 = arith.constant 0 : index
    %c0_7 = arith.constant 0 : index
    %6 = vector.load %arg4[%c0_4, %c0_5, %c0_6, %c0_7] : memref<1x4x8x8xf32, #tpu.memory_space<vmem>>, vector<1x1x8x8xf32>
    %7 = vector.shape_cast %6 : vector<1x1x8x8xf32> to vector<8x8xf32>
    %8 = vector.shape_cast %4 : vector<8x8xf32> to vector<1x1x8x8xf32>
    tpu.vector_store %arg4[%c0_4, %c0_5, %c0_6, %c0_7], %8 {strides = array<i32>} : memref<1x4x8x8xf32, #tpu.memory_space<vmem>>, vector<1x1x8x8xf32>,
    %9 = tpu.transpose %5, [1, 0] : vector<8x8xf32> -> vector<8x8xf32>
    %c0_8 = arith.constant 0 : index
    %c0_9 = arith.constant 0 : index
    %c0_10 = arith.constant 0 : index
    %c0_11 = arith.constant 0 : index
    %10 = vector.load %arg5[%c0_8, %c0_9, %c0_10, %c0_11] : memref<1x4x8x8xf32, #tpu.memory_space<vmem>>, vector<1x1x8x8xf32>
    %11 = vector.shape_cast %10 : vector<1x1x8x8xf32> to vector<8x8xf32>
    %12 = vector.shape_cast %9 : vector<8x8xf32> to vector<1x1x8x8xf32>
    tpu.vector_store %arg5[%c0_8, %c0_9, %c0_10, %c0_11], %12 {strides = array<i32>} : memref<1x4x8x8xf32, #tpu.memory_space<vmem>>, vector<1x1x8x8xf32>,
    %13 = vector.extract_strided_slice %3 {offsets = [0, 8], sizes = [8, 8], strides = [1, 1]} : vector<8x64xf32> to vector<8x8xf32>
    %14 = vector.extract_strided_slice %3 {offsets = [0, 40], sizes = [8, 8], strides = [1, 1]} : vector<8x64xf32> to vector<8x8xf32>
    %c0_12 = arith.constant 0 : index
    %c1 = arith.constant 1 : index
    %c0_13 = arith.constant 0 : index
    %c0_14 = arith.constant 0 : index
    %15 = vector.load %arg4[%c0_12, %c1, %c0_13, %c0_14] : memref<1x4x8x8xf32, #tpu.memory_space<vmem>>, vector<1x1x8x8xf32>
    %16 = vector.shape_cast %15 : vector<1x1x8x8xf32> to vector<8x8xf32>
    %17 = vector.shape_cast %13 : vector<8x8xf32> to vector<1x1x8x8xf32>
    tpu.vector_store %arg4[%c0_12, %c1, %c0_13, %c0_14], %17 {strides = array<i32>} : memref<1x4x8x8xf32, #tpu.memory_space<vmem>>, vector<1x1x8x8xf32>,
    %18 = tpu.transpose %14, [1, 0] : vector<8x8xf32> -> vector<8x8xf32>
    %c0_15 = arith.constant 0 : index
    %c1_16 = arith.constant 1 : index
    %c0_17 = arith.constant 0 : index
    %c0_18 = arith.constant 0 : index
    %19 = vector.load %arg5[%c0_15, %c1_16, %c0_17, %c0_18] : memref<1x4x8x8xf32, #tpu.memory_space<vmem>>, vector<1x1x8x8xf32>
    %20 = vector.shape_cast %19 : vector<1x1x8x8xf32> to vector<8x8xf32>
    %21 = vector.shape_cast %18 : vector<8x8xf32> to vector<1x1x8x8xf32>
    tpu.vector_store %arg5[%c0_15, %c1_16, %c0_17, %c0_18], %21 {strides = array<i32>} : memref<1x4x8x8xf32, #tpu.memory_space<vmem>>, vector<1x1x8x8xf32>,
    %22 = vector.extract_strided_slice %3 {offsets = [0, 16], sizes = [8, 8], strides = [1, 1]} : vector<8x64xf32> to vector<8x8xf32>
    %23 = vector.extract_strided_slice %3 {offsets = [0, 48], sizes = [8, 8], strides = [1, 1]} : vector<8x64xf32> to vector<8x8xf32>
    %c0_19 = arith.constant 0 : index
    %c2 = arith.constant 2 : index
    %c0_20 = arith.constant 0 : index
    %c0_21 = arith.constant 0 : index
    %24 = vector.load %arg4[%c0_19, %c2, %c0_20, %c0_21] : memref<1x4x8x8xf32, #tpu.memory_space<vmem>>, vector<1x1x8x8xf32>
    %25 = vector.shape_cast %24 : vector<1x1x8x8xf32> to vector<8x8xf32>
    %26 = vector.shape_cast %22 : vector<8x8xf32> to vector<1x1x8x8xf32>
    tpu.vector_store %arg4[%c0_19, %c2, %c0_20, %c0_21], %26 {strides = array<i32>} : memref<1x4x8x8xf32, #tpu.memory_space<vmem>>, vector<1x1x8x8xf32>,
    %27 = tpu.transpose %23, [1, 0] : vector<8x8xf32> -> vector<8x8xf32>
    %c0_22 = arith.constant 0 : index
    %c2_23 = arith.constant 2 : index
    %c0_24 = arith.constant 0 : index
    %c0_25 = arith.constant 0 : index
    %28 = vector.load %arg5[%c0_22, %c2_23, %c0_24, %c0_25] : memref<1x4x8x8xf32, #tpu.memory_space<vmem>>, vector<1x1x8x8xf32>
    %29 = vector.shape_cast %28 : vector<1x1x8x8xf32> to vector<8x8xf32>
    %30 = vector.shape_cast %27 : vector<8x8xf32> to vector<1x1x8x8xf32>
    tpu.vector_store %arg5[%c0_22, %c2_23, %c0_24, %c0_25], %30 {strides = array<i32>} : memref<1x4x8x8xf32, #tpu.memory_space<vmem>>, vector<1x1x8x8xf32>,
    %31 = vector.extract_strided_slice %3 {offsets = [0, 24], sizes = [8, 8], strides = [1, 1]} : vector<8x64xf32> to vector<8x8xf32>
    %32 = vector.extract_strided_slice %3 {offsets = [0, 56], sizes = [8, 8], strides = [1, 1]} : vector<8x64xf32> to vector<8x8xf32>
    %c0_26 = arith.constant 0 : index
    %c3 = arith.constant 3 : index
    %c0_27 = arith.constant 0 : index
    %c0_28 = arith.constant 0 : index
    %33 = vector.load %arg4[%c0_26, %c3, %c0_27, %c0_28] : memref<1x4x8x8xf32, #tpu.memory_space<vmem>>, vector<1x1x8x8xf32>
    %34 = vector.shape_cast %33 : vector<1x1x8x8xf32> to vector<8x8xf32>
    %35 = vector.shape_cast %31 : vector<8x8xf32> to vector<1x1x8x8xf32>
    tpu.vector_store %arg4[%c0_26, %c3, %c0_27, %c0_28], %35 {strides = array<i32>} : memref<1x4x8x8xf32, #tpu.memory_space<vmem>>, vector<1x1x8x8xf32>,
    %36 = tpu.transpose %32, [1, 0] : vector<8x8xf32> -> vector<8x8xf32>
    %c0_29 = arith.constant 0 : index
    %c3_30 = arith.constant 3 : index
    %c0_31 = arith.constant 0 : index
    %c0_32 = arith.constant 0 : index
    %37 = vector.load %arg5[%c0_29, %c3_30, %c0_31, %c0_32] : memref<1x4x8x8xf32, #tpu.memory_space<vmem>>, vector<1x1x8x8xf32>
    %38 = vector.shape_cast %37 : vector<1x1x8x8xf32> to vector<8x8xf32>
    %39 = vector.shape_cast %36 : vector<8x8xf32> to vector<1x1x8x8xf32>
    tpu.vector_store %arg5[%c0_29, %c3_30, %c0_31, %c0_32], %39 {strides = array<i32>} : memref<1x4x8x8xf32, #tpu.memory_space<vmem>>, vector<1x1x8x8xf32>,
    return
  }
  func.func @transform_0(%arg0: i32, %arg1: i32) -> (i32, i32, i32) {
    %c0_i32 = arith.constant 0 : i32
    %c0_i32_0 = arith.constant 0 : i32
    return %arg0, %arg1, %c0_i32 : i32, i32, i32
  }
  func.func @transform_1(%arg0: i32, %arg1: i32) -> (i32, i32) {
    %c0_i32 = arith.constant 0 : i32
    %c0_i32_0 = arith.constant 0 : i32
    %c0_i32_1 = arith.constant 0 : i32
    return %c0_i32, %c0_i32_0 : i32, i32
  }
  func.func @transform_2(%arg0: i32, %arg1: i32) -> (i32, i32, i32, i32) {
    %c0_i32 = arith.constant 0 : i32
    %c0_i32_0 = arith.constant 0 : i32
    %c0_i32_1 = arith.constant 0 : i32
    return %arg0, %c0_i32, %arg1, %c0_i32_0 : i32, i32, i32, i32
  }
  func.func @transform_3(%arg0: i32, %arg1: i32) -> (i32, i32, i32, i32) {
    %c0_i32 = arith.constant 0 : i32
    %c0_i32_0 = arith.constant 0 : i32
    %c0_i32_1 = arith.constant 0 : i32
    return %arg0, %c0_i32, %c0_i32_0, %arg1 : i32, i32, i32, i32
  }
}

</mosaic_0001>

<bundles_post_ra>
// kernel: tpu_custom_call.1
= control target key start
LH: loop header
LB: loop body
LE: loop exit
PB: predicated region body
PF: predicated region fallthrough
CT: control target
= control target key end

     0   :  { %9 = vsyncpa [#allocation3], 0  ;;  %s1277_s0 = inlined_call_operand.hbm [shape: f32[2,8,32], index: 0, kind: input, shape index: {}]   ;;  %s1278_s1 = inlined_call_operand.hbm [shape: f32[32,64], index: 1, kind: input, shape index: {}]   ;;  %s1279_s2 = inlined_call_operand.hbm [shape: f32[2,4,8,8], index: 2, kind: output, shape index: {0}]   ;;  %s1280_s3 = inlined_call_operand.hbm [shape: f32[2,4,8,8], index: 3, kind: output, shape index: {1}]  }
   0x1   :  { %11 = vsyncpa [#allocation3 + $0x1], 0 }
   0x2   :  { %12 = vsyncpa [#allocation6], 0 }
   0x3   :  { %13 = vsyncpa [#allocation4], 0 }
   0x4   :  { %15 = vsyncpa [#allocation4 + $0x1], 0 }
   0x5   :  { %16 = vsyncpa [#allocation9], 0 }
   0x6   :  { %18 = vsyncpa [#allocation9 + $0x1], 0  ;;  %s1093_s12 = smov 0   ;;  %s1095_s13 = smov 0  }
   0x7   :  { %s1097_s14 = smov 0   ;;  %s1099_s15 = smov 0  }
   0x8   :  { %s1101_s16 = smov 0   ;;  %s1103_s17 = smov 0  }
   0x9 LB: > { %s763_s18 = sadd.s32 4294967295, %s1059_s17   ;;  %p765_p0 = scmp.ge.s32.totalorder %s1059_s17, 1  ;;  %s1059_s17 = sphi %s1103_s17, %s24_s17   ;;  %s1055_s16 = sphi %s1101_s16, %s1291_s16   ;;  %s1051_s15 = sphi %s1099_s15, %s1290_s15   ;;  %s1047_s14 = sphi %s1097_s14, %s1289_s14   ;;  %s1043_s13 = sphi %s1095_s13, %s1288_s13   ;;  %s1039_s12 = sphi %s1093_s12, %s1287_s12  }
   0xa   : > { %p1125_p1 = scmp.eq.s32.totalorder %s763_s18, 0  ;;  %p146_p2 = scmp.lt.s32.totalorder %s1059_s17, 3 }
   0xb   : > { %s157_s22 = sshll.u32 %s1278_s1, 4  ;;  %s1061_s24 = smov [#allocation5]   ;;  %s158_s22 = int_to_ptr.hbm [resolvable:$true] %s157_s22 }
   0xc   : > { %p1133_p3 = pnand %p765_p0, %p146_p2  ;;  %s159_s25 = sshll.u32 %s1061_s24, 4  ;;  %s160_s25 = int_to_ptr.vmem [resolvable:$true] %s159_s25 }
   0xd   : > { %p767_p6 = scmp.ge.s32.totalorder %s1059_s17, 2  ;;  %s1062_s26 = smov 128  }
   0xe   : > { %p801_p4 = pneg %p1133_p3  ;;  %s1063_s27 = smov 8  }
   0xf   : > { %s764_s28 = sadd.s32 4294967294, %s1059_s17   ;;  %s36_s29 = sadd.s32 1, %s1055_s16 }
  0x10   : > { %p802_p5 = pnand %p801_p4, %p1125_p1  ;;  %s45_s30 = sadd.s32 1, %s1047_s14 }
  0x11   : > { %p38_p7 = scmp.ge.s32.totalorder %s36_s29, 2  ;;  %p52_p8 = scmp.ne.s32.totalorder %s1047_s14, %s1043_s13 }
  0x12   : > { %804 = dma.hbm_to_vmem [thread:$0]  (!%p802_p5), %s158_s22, 512, %s160_s25, [#allocation6], %s1062_s26, %s1062_s26, %s1063_s27  }
  0x13   : > { %p53_p9 = scmp.eq.s32.totalorder %s1059_s17, 0  ;;  %p58_p10 = scmp.ne.s32.totalorder %s1043_s13, %s1039_s12 }
  0x14   : > { %s1293_s29 = smov (%p38_p7, %s36_s29), 0  ;;  %p105_p13 = scmp.eq.s32.totalorder %s763_s18, 1 }
  0x15   : > { %p1152_p11 = por %p53_p9, %p52_p8  ;;  %p1158_p12 = por %p1125_p1, %p58_p10 }
  0x16   : > { %s40_s6 = ssub.s32 %s1055_s16, %s1293_s29  ;;  %p111_p2 = scmp.eq.s32.totalorder %s764_s28, 1 }
  0x17   : > { %p43_p0 = scmp.eq.s32.totalorder %s40_s6, 0  ;;  %p1164_p4 = por %p105_p13, %p52_p8 }
  0x18   : > { %p817_p5 = scmp.lt.s32.totalorder %s1059_s17, 2  ;;  %p1172_p7 = por %p111_p2, %p58_p10 }
  0x19   : > { %s1170_s8 = scalar_select %p43_p0, %s1047_s14, %s45_s30  }
  0x1a   : > { %s173_s10 = sand.u32 1, %s1047_s14   ;;  %s769_s20 = sshll.u32 %s1055_s16, 3 }
  0x1b   : > { %s768_s11 = sshll.u32 %s173_s10, 3  ;;  %s182_s18 = scalar_lea.hbm %s1277_s0, %s769_s20 }
  0x1c   : > { %s177_s24 = scalar_lea.vmem [#allocation2], %s768_s11  ;;  %s184_s26 = sshll.u32 %s182_s18, 4  ;;  %s185_s26 = int_to_ptr.hbm [resolvable:$true] %s184_s26 }
  0x1d   : > { %s186_s25 = sshll.u32 %s177_s24, 4  ;;  %p806_p8 = pnand %p817_p5, %p1152_p11  ;;  %s187_s25 = int_to_ptr.vmem [resolvable:$true] %s186_s25 }
  0x1e   : > { %s174_s27 = scalar_lea.sflag [#allocation3], %s173_s10  ;;  %195 = sbr.rel (%p1133_p3) target bundleno = 690 (0x2b2), region = 28 }
  0x1f   : > { %808 = dma.hbm_to_vmem [thread:$0]  (!%p806_p8), %s185_s26, 128, %s187_s25, %s174_s27  }
  0x20   : > { %s1186_s28 = sand.u32 (!%p1133_p3), 1, %s1043_s13  }
  0x21   : > { %s771_s30 = sshll.u32 (!%p1133_p3), %s1186_s28, 3  ;;  %s198_s6 = scalar_lea.sflag (!%p1133_p3), [#allocation3], %s1186_s28 }
  0x22   : > { %s201_s11 = scalar_lea.vmem (!%p1133_p3), [#allocation2], %s771_s30 }
  0x23   : > { %1022 = dma.done.wait (%p1158_p12), %s198_s6, 128  }
  0x24   : > { %1024 = vsyncadd (%p1158_p12), %s198_s6, 4294967168 }
  0x25   : > { %1026 = dma.done.wait (%p1125_p1), [#allocation6], 512  }
  0x26   : > { %1028 = vsyncadd (%p1125_p1), [#allocation6], 4294966784  ;;  %vm240_vm0 = vcmask 261120   ;;  %v239_v0 = vld [vmem:[#allocation5 + $0x18] sm:$0xff]  ;;  %v238_v1 = vld [vmem:[#allocation5 + $0x10] sm:$0xff]  ;;  %s773_s19 = sshll.u32 %s1186_s28, 5 }
  0x27   : > { %v237_v2 = vld [vmem:[#allocation5 + $0x8] sm:$0xff]  ;;  %v256_v3 = vand.u32 4294901760, %v239_v0  ;;  %v258_v4 = vand.u32 4294901760, %v238_v1  ;;  %v236_v6 = vld [vmem:[#allocation5] sm:$0xff]  ;;  %v235_v7 = vld [vmem:[%s201_s11] sm:$0xff]  ;;  %vm429_vm1 = vcmask 64512  }
  0x28   : > { %v260_v5 = vand.u32 4294901760, %v237_v2  ;;  %v262_v8 = vand.u32 4294901760, %v236_v6  ;;  %v242_v9 = vsel %vm240_vm0, %v235_v7, 0  ;;  %s1064_s23 = smov 112   ;;  %s1065_s4 = smov 120  }
  0x29   : > { %v286_v10 = vsub.f32 %v239_v0, %v256_v3  ;;  %257 = vmatpush.msra.mxu0 %v256_v3  ;;  %v292_v11 = vsub.f32 %v238_v1, %v258_v4  ;;  %357 = vmatpush.msra.mxu3 %v256_v3  ;;  %v264_v13 = vand.u32 4294901760, %v242_v9  ;;  %s1201_s5 = scalar_lea.vmem [#allocation7], %s773_s19  ;;  %s1066_s10 = smov 96  }
  0x2a   : > { %v298_v12 = vsub.f32 %v237_v2, %v260_v5  ;;  %v304_v14 = vsub.f32 %v236_v6, %v262_v8  ;;  %s1067_s20 = smov 88   ;;  %s1068_s21 = smov 80  }
  0x2b   : > { %328 = vmatpush.msra.mxu2 %v286_v10  ;;  %259 = vmatpush.msra.mxu0 %v258_v4  ;;  %v287_v15 = vand.u32 4294901760, %v286_v10  ;;  %v293_v16 = vand.u32 4294901760, %v292_v11  ;;  %v265_v17 = vsub.f32 %v242_v9, %v264_v13  ;;  %s1069_s22 = smov 104   ;;  %s1070_s18 = smov 72  }
  0x2c   : > { %v299_v18 = vand.u32 4294901760, %v298_v12  ;;  %359 = vmatpush.msra.mxu3 %v258_v4  ;;  %v305_v19 = vand.u32 4294901760, %v304_v14  ;;  %s1211_s24 = scalar_lea.vmem [#allocation8], %s773_s19  ;;  %s613_s25 = sshll.u32 %s1201_s5, 4  ;;  %s614_s25 = int_to_ptr.vmem [resolvable:$true] %s613_s25 }
  0x2d   : > { %331 = vmatpush.msra.mxu2 %v292_v11  ;;  %v288_v20 = vsub.f32 %v286_v10, %v287_v15  ;;  %261 = vmatpush.msra.mxu0 %v260_v5  ;;  %v294_v21 = vsub.f32 %v292_v11, %v293_v16  ;;  %v266_v23 = vand.u32 4294901760, %v265_v17  ;;  %s789_s26 = sshll.u32 %s1051_s15, 5  ;;  %s595_s19 = scalar_lea.sflag [#allocation4], %s1186_s28 }
  0x2e   : > { %v300_v22 = vsub.f32 %v298_v12, %v299_v18  ;;  %361 = vmatpush.msra.mxu3 %v260_v5  ;;  %v306_v27 = vsub.f32 %v304_v14, %v305_v19  ;;  %s612_s6 = scalar_lea.hbm %s1279_s2, %s789_s26 }
  0x2f   : > { %v289_v24 = vand.u32 4294901760, %v288_v20  ;;  %334 = vmatpush.msra.mxu2 %v298_v12  ;;  %v295_v25 = vand.u32 4294901760, %v294_v21  ;;  %263 = vmatpush.msra.mxu0 %v262_v8  ;;  %v267_v26 = vsub.f32 %v265_v17, %v266_v23  ;;  %s615_s11 = sshll.u32 %s612_s6, 4  ;;  %s616_s11 = int_to_ptr.hbm [resolvable:$true] %s615_s11 }
  0x30   : > { %363 = vmatpush.msra.mxu3 %v262_v8  ;;  %v301_v28 = vand.u32 4294901760, %v300_v22  ;;  %v307_v30 = vand.u32 4294901760, %v306_v27 }
  0x31   : > { %386 = vmatpush.msrb.mxu0 %v287_v15  ;;  %290 = vmatpush.msra.mxu1 %v289_v24  ;;  %v268_v29 = vand.u32 4294901760, %v267_v26 }
  0x32   : > { %337 = vmatpush.msra.mxu2 %v304_v14  ;;  %367 = vmatmul.f32.vlgmr.msra.gmra.mxu3 %v266_v23 }
  0x33   : > { %340 = vmatmul.f32.vlgmr.msra.gmra.mxu2 %v265_v17  ;;  %296 = vmatpush.msra.mxu1 %v295_v25 }
  0x34   : > { %269 = vmatmul.f32.vlgmr.msra.gmra.mxu0 %v268_v29 }
  0x35   : > { %390 = vmatpush.msrb.mxu0 %v293_v16  ;;  %302 = vmatpush.msra.mxu1 %v301_v28 }
  0x37   : > { %394 = vmatpush.msrb.mxu0 %v299_v18  ;;  %308 = vmatpush.msra.mxu1 %v307_v30 }
  0x38   : > { %310 = vmatmul.f32.vlgmr.msra.gmra.mxu1 %v264_v13 }
  0x39   : > { %398 = vmatpush.msrb.mxu0 %v305_v19  ;;  %417 = vmatpush.msrb.mxu1 %v256_v3 }
  0x3b   : > { %419 = vmatpush.msrb.mxu1 %v258_v4 }
  0x3c   : > { %400 = vmatmul.f32.vlgmr.msrb.gmra.mxu0 %v264_v13 }
  0x3d   : > { %421 = vmatpush.msrb.mxu1 %v260_v5 }
  0x3f   : > { %423 = vmatpush.msrb.mxu1 %v262_v8 }
  0x40   : > { %425 = vmatmul.f32.vlgmr.msrb.gmra.mxu1 %v264_v13 }
  0xb1   : > { %v270_v31 = vpop.f32.mrf.mxu0 }
  0xb5   : > { %v311_v32 = vpop.f32.mrf.mxu1  ;;  %v368_v35 = vpop.f32.mrf.mxu3 }
  0xb6   : > { %v341_v33 = vpop.f32.mrf.mxu2  ;;  %v312_v34 = vadd.f32 %v311_v32, %v270_v31 }
  0xb8   : > { %v342_v36 = vadd.f32 %v341_v33, %v312_v34 }
  0xb9   : > { %v401_v37 = vpop.f32.mrf.mxu0 }
  0xba   : > { %v369_v38 = vadd.f32 %v368_v35, %v342_v36 }
  0xbc   : > { %v402_v39 = vadd.f32 %v401_v37, %v369_v38 }
  0xbd   : > { %v426_v40 = vpop.f32.mrf.mxu1 }
  0xbe   : > { %v427_v41 = vadd.f32 %v426_v40, %v402_v39 }
  0xc0   : > { %510 = vrot.lane.b32.xlu2 %v427_v41, %s1064_s23  ;;  %468 = vrot.lane.b32.xlu1 %v427_v41, %s1065_s4  ;;  %430 = vst.msk [vmem:[%s1201_s5] sm:$0xff] %vm429_vm1, %v427_v41  ;;  %s955_s23 = sshra.s32 %s616_s11, 4  ;;  %s956_s23 = int_to_ptr.hbm [resolvable:$true] %s955_s23 }
  0xc1   : > { %432 = vrot.lane.b32.xlu0 %v427_v41, %s1066_s10  ;;  %s957_s4 = scalar_lea.hbm %s956_s23, 32  ;;  %p962_p10 = scmp.lt.s32.totalorder %s956_s23, %s1279_s2 }
  0xc2   : > { %p958_p1 = scmp.ne.s32.totalorder %s956_s23, %s957_s4 }
  0xc4   : > { %p959_p3 = pnand %p958_p1, %p1164_p4 }
  0xc6   : > { %p960_p9 = pneg %p959_p3 }
  0xc8   : > { %473 = vrot.lane.b32.xlu1 %v427_v41, %s1067_s20 }
  0xd0   : > { %515 = vrot.lane.b32.xlu1 %v427_v41, %s1068_s21 }
 0x11a   : > { %v511_v42 = vpop.permute.xlu2 %510 }
 0x11b   : > { %777 = vst.msk [vmem:[%s1201_s5 + $0x10] sm:$0xff] %vm429_vm1, %v511_v42 }
 0x132   : > { %v469_v43 = vpop.permute.xlu1 %468 }
 0x133   : > { %775 = vst.msk [vmem:[%s1201_s5 + $0x8] sm:$0xff] %vm429_vm1, %v469_v43  ;;  %v433_v44 = vpop.permute.xlu0 %432 }
 0x134   : > { %435 = vxpose.xlu0.b32.start.end [1/1] (short) (narrow) %v433_v44, 8 }
 0x13a   : > { %v474_v45 = vpop.permute.xlu1 %473 }
 0x13b   : > { %476 = vxpose.xlu2.b32.start.end [1/1] (short) (narrow) %v474_v45, 8 }
 0x142   : > { %v516_v46 = vpop.permute.xlu1 %515 }
 0x143   : > { %518 = vxpose.xlu1.b32.start.end [1/1] (short) (narrow) %v516_v46, 8 }
 0x19d   : > { %552 = vrot.lane.b32.xlu1 %v427_v41, %s1069_s22 }
 0x1a2   : > { %557 = vrot.lane.b32.xlu0 %v427_v41, %s1070_s18 }
 0x1d4   : > { %v492_v49 = vpop.trf.xlu2 }
 0x1d5   : > { %776 = vst.msk [vmem:[%s1211_s24 + $0x8] sm:$0xff] %vm429_vm1, %v492_v49 }
 0x1d8   : > { %v451_v47 = vpop.trf.xlu0 }
 0x1d9   : > { %467 = vst.msk [vmem:[%s1211_s24] sm:$0xff] %vm429_vm1, %v451_v47 }
 0x1e7   : > { %v534_v48 = vpop.trf.xlu1 }
 0x1e8   : > { %778 = vst.msk [vmem:[%s1211_s24 + $0x10] sm:$0xff] %vm429_vm1, %v534_v48 }
 0x20f   : > { %v553_v50 = vpop.permute.xlu1 %552 }
 0x210   : > { %779 = vst.msk [vmem:[%s1201_s5 + $0x18] sm:$0xff] %vm429_vm1, %v553_v50  ;;  %s961_s5 = scalar_lea.hbm %s1279_s2, 64 }
 0x211   : > { %p963_p11 = scmp.lt.s32.totalorder %s961_s5, %s957_s4 }
 0x213   : > { %p964_p12 = por %p963_p11, %p962_p10 }
 0x214   : > { %v558_v51 = vpop.permute.xlu0 %557 }
 0x215   : > { %560 = vxpose.xlu2.b32.start.end [1/1] (short) (narrow) %v558_v51, 8  ;;  %p965_p13 = pnand %p964_p12, %p960_p9 }
 0x217   : > { %968 = shalt.err (!%p965_p13)
}
 0x218   : > { %s1071_s22 = smov 128   ;;  %s1072_s18 = smov 8  }
 0x219   : > { %797 = dma.vmem_to_hbm [thread:$0]  (%p1164_p4), %s614_s25, 512, %s616_s11, %s595_s19, %s1071_s22, %s1071_s22, %s1072_s18  }
 0x21a   : > { %s630_s6 = scalar_lea.hbm %s1280_s3, %s789_s26  ;;  %s631_s10 = sshll.u32 %s1211_s24, 4  ;;  %s632_s10 = int_to_ptr.vmem [resolvable:$true] %s631_s10 }
 0x21b   : > { %s633_s20 = sshll.u32 %s630_s6, 4  ;;  %s600_s23 = scalar_lea.sflag [#allocation9], %s1186_s28  ;;  %s634_s20 = int_to_ptr.hbm [resolvable:$true] %s633_s20 }
 0x21c   : > { %s983_s4 = sshra.s32 %s634_s20, 4  ;;  %s989_s19 = scalar_lea.hbm %s1280_s3, 64  ;;  %s984_s4 = int_to_ptr.hbm [resolvable:$true] %s983_s4 }
 0x21d   : > { %s985_s5 = scalar_lea.hbm %s984_s4, 32  ;;  %p990_p8 = scmp.lt.s32.totalorder %s984_s4, %s1280_s3 }
 0x21e   : > { %p986_p0 = scmp.ne.s32.totalorder %s984_s4, %s985_s5  ;;  %p991_p1 = scmp.lt.s32.totalorder %s989_s19, %s985_s5 }
 0x220   : > { %p987_p2 = pnand %p986_p0, %p1164_p4  ;;  %p992_p3 = por %p991_p1, %p990_p8 }
 0x222   : > { %p988_p5 = pneg %p987_p2 }
 0x224   : > { %p993_p9 = pnand %p992_p3, %p988_p5 }
 0x2ae   : > { %v576_v52 = vpop.trf.xlu2 }
 0x2af   : > { %780 = vst.msk [vmem:[%s1211_s24 + $0x18] sm:$0xff] %vm429_vm1, %v576_v52 }
 0x2b0   : > { %996 = shalt.err (!%p993_p9)
}
 0x2b1   : > { %798 = dma.vmem_to_hbm [thread:$0]  (%p1164_p4), %s632_s10, 512, %s634_s20, %s600_s23, %s1071_s22, %s1071_s22, %s1072_s18  }
 0x2b2 PF: > { %s648_s28 = sand.u32 1, %s1039_s12   ;;  %p810_p10 = pnand %p767_p6, %p1172_p7 }
 0x2b3   : > { %s649_s24 = scalar_lea.sflag [#allocation4], %s648_s28 }
 0x2b4   : > { %p811_p11 = pneg %p810_p10 }
 0x2b6   : > { %1030 = dma.done.wait (%p811_p11), %s649_s24, 512  }
 0x2b7   : > { %1032 = vsyncadd (%p811_p11), %s649_s24, 4294966784  ;;  %s659_s21 = scalar_lea.sflag [#allocation9], %s648_s28 }
 0x2b8   : > { %1034 = dma.done.wait (%p811_p11), %s659_s21, 512  }
 0x2b9   : > { %1036 = vsyncadd (%p811_p11), %s659_s21, 4294966784  ;;  %s24_s17 = sadd.s32 1, %s1059_s17   ;;  %s1287_s12 = smov %s1043_s13 }
 0x2ba   : > { %p21_p12 = scmp.ge.s32.totalorder %s24_s17, 4   ;;  %s1288_s13 = smov %s1047_s14 }
 0x2bb   : > { %s1289_s14 = smov %s1170_s8  ;;  %s1290_s15 = smov %s1055_s16 }
 0x2bc   : > { %s1291_s16 = smov %s1293_s29  ;;  %23 = sbr.rel (!%p21_p12) target bundleno = 9 (0x9), region = 100 }
 0x2c1   :  { %665 = vsyncpa [#allocation3], 1 }
 0x2c2   :  { %667 = vsyncpa [#allocation3 + $0x1], 1 }
 0x2c3   :  { %668 = vsyncpa [#allocation6], 1 }
 0x2c4   :  { %669 = vsyncpa [#allocation4], 1 }
 0x2c5   :  { %671 = vsyncpa [#allocation4 + $0x1], 1 }
 0x2c6   :  { %672 = vsyncpa [#allocation9], 1 }
 0x2c7   :  { %674 = vsyncpa [#allocation9 + $0x1], 1 }

</bundles_post_ra>
